<compile_context>
chip_gen: v7x
topology: tpu7x:2x2x1
jax: 0.10.0
libtpu: 0.0.40
codegen_flags: <defaults>
</compile_context>

<pallas_src>
import jax
import jax.numpy as jnp
import numpy as np
from jax.experimental import pallas as pl
from jax.experimental.pallas import tpu as pltpu


# ---------------------------------------------------------------------------
# Fused kernel (one batch block)
# ---------------------------------------------------------------------------
def _tpa_fused_kernel(hcol_ref, ht_ref, wc_ref, w1p_ref, a2_ref, w2h_ref,
                      p2w2v_ref, out_ref, zflat_ref):
    # hcol_ref  : (T*BB, K+1) im2col rows ordered (t, b); trailing ones column
    # ht_ref    : (BB, A+1)   ht rows with trailing ones column
    # wc_ref    : (K+1, F)    compact conv filter bank + conv-bias row
    # w1p_ref   : (A+1, N)    linear1 weight gathered onto the flat axis + b1 row
    # a2_ref    : (N, T)      a2[j, i] = [torch view row of flat j == i]
    # w2h_ref   : (A+1, A)    W2[:, :A].T + b2 row
    # p2w2v_ref : (N, A)      W2[:, A:].T gathered onto the flat axis
    # out_ref   : (BB, A)
    # zflat_ref : (BB, N)     f32 scratch: flat ReLU(conv) in order j = t*F + f
    f32 = jnp.float32
    bb = ht_ref.shape[0]
    fn = wc_ref.shape[1]                 # filter_num
    feat = hcol_ref.shape[0] // bb       # feat_size (T)

    # Compact im2col conv + bias (ones-column fold) + ReLU: ONE MXU dot.
    zs = jnp.dot(hcol_ref[...], wc_ref[...], preferred_element_type=f32)
    zs = jnp.maximum(zs, 0.0)                                    # (T*BB, F) f32

    # Scatter the (t, b)-row result onto the flat lane axis j = t*F + f
    # (static sublane-aligned slices -> lane-slice stores; this replaces the
    #  torch row-major .view which is otherwise not a TPU-friendly layout).
    for t in range(feat):
        zflat_ref[:, t * fn:(t + 1) * fn] = zs[t * bb:(t + 1) * bb, :]
    z = zflat_ref[...]                                           # (BB, N) f32

    hta = ht_ref[...]
    # linear1 broadcast onto the flat axis (the .view scramble is folded
    # into w1p on the host):  wsel[b, j] = (ht @ W1.T + b1)[b, view_n(j)]
    wsel = jnp.dot(hta, w1p_ref[...], preferred_element_type=f32)      # (BB, N)

    a2 = a2_ref[...].astype(f32)
    # s[b, i] = sum_n conv_vecs[b, i, n] * w[b, n]   (torch mul + sum(dim=2))
    s = jnp.dot(z * wsel, a2, preferred_element_type=f32)              # (BB, T)
    alpha = jax.nn.sigmoid(s)                                          # f32 EUP

    # alpha broadcast back to the flat axis: contract a2's T axis (no a2t input)
    alpha_sel = jax.lax.dot_general(alpha, a2, (((1,), (1,)), ((), ())),
                                    preferred_element_type=f32)        # (BB, N)

    # out = ht @ W2[:, :A].T + b2  +  v @ W2[:, A:].T
    out = (jnp.dot(hta, w2h_ref[...], preferred_element_type=f32)
           + jnp.dot(alpha_sel * z, p2w2v_ref[...].astype(f32),
                     preferred_element_type=f32))
    out_ref[...] = out.astype(out_ref.dtype)                    # single bulk store


# ---------------------------------------------------------------------------
# One-time weight re-layout (hoisted out of the per-step path)
# ---------------------------------------------------------------------------
def prepare_tpa_params(params, *, matmul_dtype=jnp.bfloat16):
    Wc = jnp.asarray(params["conv_w"], jnp.float32)   # (F, 1, L, S)
    bc = jnp.asarray(params["conv_b"], jnp.float32)   # (F,)
    W1 = jnp.asarray(params["w1"], jnp.float32)       # (F, A)
    b1 = jnp.asarray(params["b1"], jnp.float32)       # (F,)
    W2 = jnp.asarray(params["w2"], jnp.float32)       # (A, A+F)
    b2 = jnp.asarray(params["b2"], jnp.float32)       # (A,)

    F, _, L, S = Wc.shape
    A = W1.shape[1]
    T = A - S + 1                      # feat_size
    K = S * L                          # im2col contraction length
    N = T * F                          # flat conv length (kernel order j = t*F+f)

    # Compact conv filter bank, im2col order k = s*L + l, plus conv-bias row.
    w_stack = jnp.transpose(Wc[:, 0], (2, 1, 0)).reshape(K, F)           # (K, F)
    wc_aug = jnp.concatenate([w_stack, bc[None, :]], axis=0)             # (K+1, F)

    # The kernel's flat layout is j = t*F + f.  PyTorch stores the conv result
    # as f*T + t and row-major .view's it as (feat_size, filter_num), so flat
    # element j is read by torch at (view_i, view_n):
    j = np.arange(N)
    t_of, f_of = j // F, j % F
    jt = f_of * T + t_of               # torch memory-order flat index
    view_i = jt // F                   # conv_vecs row  (feat index)
    view_n = jt % F                    # conv_vecs col  (filter index)

    a2 = jnp.asarray(view_i[:, None] == np.arange(T)[None, :], jnp.float32)  # (N, T)
    w1p = jnp.concatenate([W1.T[:, view_n], b1[view_n][None, :]], axis=0)    # (A+1, N)
    w2h = jnp.concatenate([W2[:, :A].T, b2[None, :]], axis=0)                # (A+1, A)
    p2w2v = W2[:, A:].T[view_n, :]                                           # (N, A)

    dt = matmul_dtype
    return {"wc_aug": wc_aug.astype(dt), "w1p": w1p.astype(dt),
            "a2": a2.astype(dt), "w2h": w2h.astype(dt),
            "p2w2v": p2w2v.astype(dt)}


def _round_up(x, m):
    return (x + m - 1) // m * m


# ---------------------------------------------------------------------------
# Per-call wrapper: im2col + batch blocking (cheap XLA glue), one pallas_call
# ---------------------------------------------------------------------------
def temporal_pattern_attention(H, ht, packed, *, block_b=None):
    wc_aug, w1p, a2 = packed["wc_aug"], packed["w1p"], packed["a2"]
    w2h, p2w2v = packed["w2h"], packed["p2w2v"]

    B, C, L, A = H.shape
    Kp, Fn = wc_aug.shape                    # K+1, filter_num
    N, T = a2.shape                          # F*T, feat_size
    S = A - T + 1
    assert C == 1 and Kp == S * L + 1 and N == T * Fn
    dt = wc_aug.dtype
    f32 = jnp.float32

    # ---- data-dependent prep: im2col of H + ones columns (bias folds) ----
    h3 = H[:, 0].astype(f32)                                               # (B, L, A)
    cols = jnp.stack([h3[:, :, s:s + T] for s in range(S)], axis=1)        # (B, S, L, T)
    hcol = cols.transpose(0, 3, 1, 2).reshape(B, T, S * L)                 # (B, T, K)
    hcol = jnp.concatenate([hcol, jnp.ones((B, T, 1), f32)], axis=-1)      # (B, T, K+1)
    hta = jnp.concatenate([ht.astype(f32), jnp.ones((B, 1), f32)], axis=-1)

    # ---- batch padding / blocking: rows on sublanes, multiple of 8 ----
    BB = min(_round_up(B, 8), 32) if block_b is None else block_b
    assert BB % 8 == 0
    B_pad = _round_up(B, BB)
    nblk = B_pad // BB
    if B_pad != B:
        hcol = jnp.concatenate([hcol, jnp.zeros((B_pad - B, T, Kp), f32)], axis=0)
        hta = jnp.concatenate([hta, jnp.zeros((B_pad - B, A + 1), f32)], axis=0)

    # Rows ordered (block, t, b) so each grid block is contiguous and the
    # kernel can scatter per-t row groups straight onto the flat lane axis.
    hcol2d = (hcol.reshape(nblk, BB, T, Kp).transpose(0, 2, 1, 3)
                   .reshape(nblk * T * BB, Kp)).astype(dt)
    hta = hta.astype(dt)

    out_shape = jax.ShapeDtypeStruct((B_pad, A), f32)
    scratch = [pltpu.VMEM((BB, N), f32)]
    weights = (wc_aug, w1p, a2, w2h, p2w2v)

    if nblk == 1:
        # Single block: no grid (no 1-step-grid overhead, no double buffering);
        # whole arrays resident in VMEM.
        out = pl.pallas_call(
            _tpa_fused_kernel,
            out_shape=out_shape,
            in_specs=[pl.BlockSpec(memory_space=pltpu.MemorySpace.VMEM)
                      for _ in range(7)],
            out_specs=pl.BlockSpec(memory_space=pltpu.MemorySpace.VMEM),
            scratch_shapes=scratch,
        )(hcol2d, hta, *weights)
    else:
        # Real batch axis: block over batch, "parallel" so v7x shards the grid
        # across its two TensorCores.
        out = pl.pallas_call(
            _tpa_fused_kernel,
            out_shape=out_shape,
            grid=(nblk,),
            in_specs=[
                pl.BlockSpec((T * BB, Kp), lambda i: (i, 0)),   # hcol (batch-blocked)
                pl.BlockSpec((BB, A + 1), lambda i: (i, 0)),    # ht   (batch-blocked)
                pl.BlockSpec((Kp, Fn), lambda i: (0, 0)),       # weights: resident
                pl.BlockSpec((A + 1, N), lambda i: (0, 0)),
                pl.BlockSpec((N, T), lambda i: (0, 0)),
                pl.BlockSpec((A + 1, A), lambda i: (0, 0)),
                pl.BlockSpec((N, A), lambda i: (0, 0)),
            ],
            out_specs=pl.BlockSpec((BB, A), lambda i: (i, 0)),
            scratch_shapes=scratch,
            compiler_params=pltpu.CompilerParams(
                dimension_semantics=("parallel",)),
        )(hcol2d, hta, *weights)
    return out[:B]


# ---------------------------------------------------------------------------
# Pure-JAX reference (mirrors the PyTorch forward exactly)
# ---------------------------------------------------------------------------
def reference_forward(H, ht, params):
    Wc, bc, W1, b1, W2, b2 = (params["conv_w"], params["conv_b"],
                              params["w1"], params["b1"],
                              params["w2"], params["b2"])
    B = H.shape[0]
    filter_num = Wc.shape[0]
    feat_size = H.shape[-1] - Wc.shape[-1] + 1

    w = ht @ W1.T + b1                                        # (B, filter_num)
    conv = jax.lax.conv_general_dilated(
        H, Wc, window_strides=(1, 1), padding="VALID",
        dimension_numbers=("NCHW", "OIHW", "NCHW"))
    conv = conv + bc[None, :, None, None]                     # (B, F, 1, T)
    conv_vecs = conv.reshape(B, feat_size, filter_num)        # torch .view (reinterpret)
    conv_vecs = jnp.maximum(conv_vecs, 0.0)
    s = jnp.sum(conv_vecs * w[:, None, :], axis=2)            # (B, feat_size)
    alpha = jax.nn.sigmoid(s)
    v = jnp.sum(alpha[:, :, None] * conv_vecs, axis=1)        # (B, filter_num)
    concat = jnp.concatenate([ht, v], axis=1)
    return concat @ W2.T + b2


if __name__ == "__main__":
    attn_len, attn_size = 8, 16
    filter_size, filter_num = 3, 8

    key = jax.random.PRNGKey(0)
    ks = jax.random.split(key, 8)
    params = {
        "conv_w": 0.1 * jax.random.normal(ks[0], (filter_num, 1, attn_len, filter_size), jnp.float32),
        "conv_b": 0.1 * jax.random.normal(ks[1], (filter_num,), jnp.float32),
        "w1":     0.1 * jax.random.normal(ks[2], (filter_num, attn_size), jnp.float32),
        "b1":     0.1 * jax.random.normal(ks[3], (filter_num,), jnp.float32),
        "w2":     0.1 * jax.random.normal(ks[4], (attn_size, attn_size + filter_num), jnp.float32),
        "b2":     0.1 * jax.random.normal(ks[5], (attn_size,), jnp.float32),
    }

    # Weight re-layout happens ONCE (hoisted out of the per-step path).
    packed = prepare_tpa_params(params, matmul_dtype=jnp.bfloat16)
    tpa = jax.jit(temporal_pattern_attention, static_argnames=("block_b",))

    # --- check 1: module's natural tiny shape (B=2) -> single-block, no-grid path
    B = 2
    H = jax.random.normal(ks[6], (B, 1, attn_len, attn_size), jnp.float32)
    ht = jax.random.normal(ks[7], (B, attn_size), jnp.float32)
    out = jax.block_until_ready(tpa(H, ht, packed))
    ref = jax.block_until_ready(reference_forward(H, ht, params))
    np.testing.assert_allclose(np.asarray(out), np.asarray(ref), rtol=2e-2, atol=2e-2)

    # --- check 2: batched rows -> blocked "parallel" grid path (both v7x cores)
    Bb = 64
    kb = jax.random.split(jax.random.PRNGKey(1), 2)
    Hb = jax.random.normal(kb[0], (Bb, 1, attn_len, attn_size), jnp.float32)
    htb = jax.random.normal(kb[1], (Bb, attn_size), jnp.float32)
    outb = jax.block_until_ready(tpa(Hb, htb, packed, block_b=16))
    refb = jax.block_until_ready(reference_forward(Hb, htb, params))
    np.testing.assert_allclose(np.asarray(outb), np.asarray(refb), rtol=2e-2, atol=2e-2)

    print("KERNEL_OK")
</pallas_src>

<mosaic_0001>
module attributes {stable_mosaic.version = 11 : i64} {
  func.func @_tpa_fused_kernel(%arg0: memref<112x25xbf16, #tpu.memory_space<vmem>>, %arg1: memref<8x17xbf16, #tpu.memory_space<vmem>>, %arg2: memref<25x8xbf16, #tpu.memory_space<vmem>>, %arg3: memref<17x112xbf16, #tpu.memory_space<vmem>>, %arg4: memref<112x14xbf16, #tpu.memory_space<vmem>>, %arg5: memref<17x16xbf16, #tpu.memory_space<vmem>>, %arg6: memref<112x16xbf16, #tpu.memory_space<vmem>>, %arg7: memref<8x16xf32, #tpu.memory_space<vmem>>, %arg8: memref<8x112xf32, #tpu.memory_space<vmem>>) attributes {dimension_semantics = [], scalar_prefetch = 0 : i64, scratch_operands = 1 : i64, tpu.core_type = #tpu.core_type<tc>} {
    %c0 = arith.constant 0 : index
    %c0_0 = arith.constant 0 : index
    %0 = vector.load %arg0[%c0, %c0_0] : memref<112x25xbf16, #tpu.memory_space<vmem>>, vector<112x25xbf16>
    %c0_1 = arith.constant 0 : index
    %c0_2 = arith.constant 0 : index
    %1 = vector.load %arg2[%c0_1, %c0_2] : memref<25x8xbf16, #tpu.memory_space<vmem>>, vector<25x8xbf16>
    %cst = arith.constant dense<0.000000e+00> : vector<112x8xf32>
    %2 = tpu.matmul %0, %1, %cst {dimension_numbers = #tpu.dot_dimension_numbers<[1], [0], [0], [1], [0, 0, 1, 1], [], []>} : vector<112x25xbf16>, vector<25x8xbf16>, vector<112x8xf32> -> vector<112x8xf32>
    %cst_3 = arith.constant 0.000000e+00 : f32
    %3 = vector.broadcast %cst_3 : f32 to vector<112x8xf32>
    %4 = arith.maximumf %2, %3 : vector<112x8xf32>
    %5 = vector.extract_strided_slice %4 {offsets = [0, 0], sizes = [8, 8], strides = [1, 1]} : vector<112x8xf32> to vector<8x8xf32>
    %c0_4 = arith.constant 0 : index
    %c0_5 = arith.constant 0 : index
    %6 = vector.load %arg8[%c0_4, %c0_5] : memref<8x112xf32, #tpu.memory_space<vmem>>, vector<8x8xf32>
    tpu.vector_store %arg8[%c0_4, %c0_5], %5 {strides = array<i32>} : memref<8x112xf32, #tpu.memory_space<vmem>>, vector<8x8xf32>,
    %7 = vector.extract_strided_slice %4 {offsets = [8, 0], sizes = [8, 8], strides = [1, 1]} : vector<112x8xf32> to vector<8x8xf32>
    %c0_6 = arith.constant 0 : index
    %c8 = arith.constant 8 : index
    %8 = vector.load %arg8[%c0_6, %c8] : memref<8x112xf32, #tpu.memory_space<vmem>>, vector<8x8xf32>
    tpu.vector_store %arg8[%c0_6, %c8], %7 {strides = array<i32>} : memref<8x112xf32, #tpu.memory_space<vmem>>, vector<8x8xf32>,
    %9 = vector.extract_strided_slice %4 {offsets = [16, 0], sizes = [8, 8], strides = [1, 1]} : vector<112x8xf32> to vector<8x8xf32>
    %c0_7 = arith.constant 0 : index
    %c16 = arith.constant 16 : index
    %10 = vector.load %arg8[%c0_7, %c16] : memref<8x112xf32, #tpu.memory_space<vmem>>, vector<8x8xf32>
    tpu.vector_store %arg8[%c0_7, %c16], %9 {strides = array<i32>} : memref<8x112xf32, #tpu.memory_space<vmem>>, vector<8x8xf32>,
    %11 = vector.extract_strided_slice %4 {offsets = [24, 0], sizes = [8, 8], strides = [1, 1]} : vector<112x8xf32> to vector<8x8xf32>
    %c0_8 = arith.constant 0 : index
    %c24 = arith.constant 24 : index
    %12 = vector.load %arg8[%c0_8, %c24] : memref<8x112xf32, #tpu.memory_space<vmem>>, vector<8x8xf32>
    tpu.vector_store %arg8[%c0_8, %c24], %11 {strides = array<i32>} : memref<8x112xf32, #tpu.memory_space<vmem>>, vector<8x8xf32>,
    %13 = vector.extract_strided_slice %4 {offsets = [32, 0], sizes = [8, 8], strides = [1, 1]} : vector<112x8xf32> to vector<8x8xf32>
    %c0_9 = arith.constant 0 : index
    %c32 = arith.constant 32 : index
    %14 = vector.load %arg8[%c0_9, %c32] : memref<8x112xf32, #tpu.memory_space<vmem>>, vector<8x8xf32>
    tpu.vector_store %arg8[%c0_9, %c32], %13 {strides = array<i32>} : memref<8x112xf32, #tpu.memory_space<vmem>>, vector<8x8xf32>,
    %15 = vector.extract_strided_slice %4 {offsets = [40, 0], sizes = [8, 8], strides = [1, 1]} : vector<112x8xf32> to vector<8x8xf32>
    %c0_10 = arith.constant 0 : index
    %c40 = arith.constant 40 : index
    %16 = vector.load %arg8[%c0_10, %c40] : memref<8x112xf32, #tpu.memory_space<vmem>>, vector<8x8xf32>
    tpu.vector_store %arg8[%c0_10, %c40], %15 {strides = array<i32>} : memref<8x112xf32, #tpu.memory_space<vmem>>, vector<8x8xf32>,
    %17 = vector.extract_strided_slice %4 {offsets = [48, 0], sizes = [8, 8], strides = [1, 1]} : vector<112x8xf32> to vector<8x8xf32>
    %c0_11 = arith.constant 0 : index
    %c48 = arith.constant 48 : index
    %18 = vector.load %arg8[%c0_11, %c48] : memref<8x112xf32, #tpu.memory_space<vmem>>, vector<8x8xf32>
    tpu.vector_store %arg8[%c0_11, %c48], %17 {strides = array<i32>} : memref<8x112xf32, #tpu.memory_space<vmem>>, vector<8x8xf32>,
    %19 = vector.extract_strided_slice %4 {offsets = [56, 0], sizes = [8, 8], strides = [1, 1]} : vector<112x8xf32> to vector<8x8xf32>
    %c0_12 = arith.constant 0 : index
    %c56 = arith.constant 56 : index
    %20 = vector.load %arg8[%c0_12, %c56] : memref<8x112xf32, #tpu.memory_space<vmem>>, vector<8x8xf32>
    tpu.vector_store %arg8[%c0_12, %c56], %19 {strides = array<i32>} : memref<8x112xf32, #tpu.memory_space<vmem>>, vector<8x8xf32>,
    %21 = vector.extract_strided_slice %4 {offsets = [64, 0], sizes = [8, 8], strides = [1, 1]} : vector<112x8xf32> to vector<8x8xf32>
    %c0_13 = arith.constant 0 : index
    %c64 = arith.constant 64 : index
    %22 = vector.load %arg8[%c0_13, %c64] : memref<8x112xf32, #tpu.memory_space<vmem>>, vector<8x8xf32>
    tpu.vector_store %arg8[%c0_13, %c64], %21 {strides = array<i32>} : memref<8x112xf32, #tpu.memory_space<vmem>>, vector<8x8xf32>,
    %23 = vector.extract_strided_slice %4 {offsets = [72, 0], sizes = [8, 8], strides = [1, 1]} : vector<112x8xf32> to vector<8x8xf32>
    %c0_14 = arith.constant 0 : index
    %c72 = arith.constant 72 : index
    %24 = vector.load %arg8[%c0_14, %c72] : memref<8x112xf32, #tpu.memory_space<vmem>>, vector<8x8xf32>
    tpu.vector_store %arg8[%c0_14, %c72], %23 {strides = array<i32>} : memref<8x112xf32, #tpu.memory_space<vmem>>, vector<8x8xf32>,
    %25 = vector.extract_strided_slice %4 {offsets = [80, 0], sizes = [8, 8], strides = [1, 1]} : vector<112x8xf32> to vector<8x8xf32>
    %c0_15 = arith.constant 0 : index
    %c80 = arith.constant 80 : index
    %26 = vector.load %arg8[%c0_15, %c80] : memref<8x112xf32, #tpu.memory_space<vmem>>, vector<8x8xf32>
    tpu.vector_store %arg8[%c0_15, %c80], %25 {strides = array<i32>} : memref<8x112xf32, #tpu.memory_space<vmem>>, vector<8x8xf32>,
    %27 = vector.extract_strided_slice %4 {offsets = [88, 0], sizes = [8, 8], strides = [1, 1]} : vector<112x8xf32> to vector<8x8xf32>
    %c0_16 = arith.constant 0 : index
    %c88 = arith.constant 88 : index
    %28 = vector.load %arg8[%c0_16, %c88] : memref<8x112xf32, #tpu.memory_space<vmem>>, vector<8x8xf32>
    tpu.vector_store %arg8[%c0_16, %c88], %27 {strides = array<i32>} : memref<8x112xf32, #tpu.memory_space<vmem>>, vector<8x8xf32>,
    %29 = vector.extract_strided_slice %4 {offsets = [96, 0], sizes = [8, 8], strides = [1, 1]} : vector<112x8xf32> to vector<8x8xf32>
    %c0_17 = arith.constant 0 : index
    %c96 = arith.constant 96 : index
    %30 = vector.load %arg8[%c0_17, %c96] : memref<8x112xf32, #tpu.memory_space<vmem>>, vector<8x8xf32>
    tpu.vector_store %arg8[%c0_17, %c96], %29 {strides = array<i32>} : memref<8x112xf32, #tpu.memory_space<vmem>>, vector<8x8xf32>,
    %31 = vector.extract_strided_slice %4 {offsets = [104, 0], sizes = [8, 8], strides = [1, 1]} : vector<112x8xf32> to vector<8x8xf32>
    %c0_18 = arith.constant 0 : index
    %c104 = arith.constant 104 : index
    %32 = vector.load %arg8[%c0_18, %c104] : memref<8x112xf32, #tpu.memory_space<vmem>>, vector<8x8xf32>
    tpu.vector_store %arg8[%c0_18, %c104], %31 {strides = array<i32>} : memref<8x112xf32, #tpu.memory_space<vmem>>, vector<8x8xf32>,
    %c0_19 = arith.constant 0 : index
    %c0_20 = arith.constant 0 : index
    %33 = vector.load %arg8[%c0_19, %c0_20] : memref<8x112xf32, #tpu.memory_space<vmem>>, vector<8x112xf32>
    %c0_21 = arith.constant 0 : index
    %c0_22 = arith.constant 0 : index
    %34 = vector.load %arg1[%c0_21, %c0_22] : memref<8x17xbf16, #tpu.memory_space<vmem>>, vector<8x17xbf16>
    %c0_23 = arith.constant 0 : index
    %c0_24 = arith.constant 0 : index
    %35 = vector.load %arg3[%c0_23, %c0_24] : memref<17x112xbf16, #tpu.memory_space<vmem>>, vector<17x112xbf16>
    %cst_25 = arith.constant dense<0.000000e+00> : vector<8x112xf32>
    %36 = tpu.matmul %34, %35, %cst_25 {dimension_numbers = #tpu.dot_dimension_numbers<[1], [0], [0], [1], [0, 0, 1, 1], [], []>} : vector<8x17xbf16>, vector<17x112xbf16>, vector<8x112xf32> -> vector<8x112xf32>
    %c0_26 = arith.constant 0 : index
    %c0_27 = arith.constant 0 : index
    %37 = vector.load %arg4[%c0_26, %c0_27] : memref<112x14xbf16, #tpu.memory_space<vmem>>, vector<112x14xbf16>
    %38 = arith.extf %37 : vector<112x14xbf16> to vector<112x14xf32>
    %39 = arith.mulf %33, %36 : vector<8x112xf32>
    %cst_28 = arith.constant dense<0.000000e+00> : vector<8x14xf32>
    %40 = tpu.matmul %39, %38, %cst_28 {dimension_numbers = #tpu.dot_dimension_numbers<[1], [0], [0], [1], [0, 0, 1, 1], [], []>} : vector<8x112xf32>, vector<112x14xf32>, vector<8x14xf32> -> vector<8x14xf32>
    %41 = arith.negf %40 : vector<8x14xf32>
    %42 = math.exp %41 : vector<8x14xf32>
    %cst_29 = arith.constant 1.000000e+00 : f32
    %43 = vector.broadcast %cst_29 : f32 to vector<8x14xf32>
    %44 = arith.addf %43, %42 : vector<8x14xf32>
    %45 = arith.divf %43, %44 : vector<8x14xf32>
    %cst_30 = arith.constant dense<0.000000e+00> : vector<8x112xf32>
    %46 = tpu.matmul %45, %38, %cst_30 {dimension_numbers = #tpu.dot_dimension_numbers<[1], [1], [0], [0], [0, 0, 1, 0], [], []>} : vector<8x14xf32>, vector<112x14xf32>, vector<8x112xf32> -> vector<8x112xf32>
    %c0_31 = arith.constant 0 : index
    %c0_32 = arith.constant 0 : index
    %47 = vector.load %arg5[%c0_31, %c0_32] : memref<17x16xbf16, #tpu.memory_space<vmem>>, vector<17x16xbf16>
    %cst_33 = arith.constant dense<0.000000e+00> : vector<8x16xf32>
    %48 = tpu.matmul %34, %47, %cst_33 {dimension_numbers = #tpu.dot_dimension_numbers<[1], [0], [0], [1], [0, 0, 1, 1], [], []>} : vector<8x17xbf16>, vector<17x16xbf16>, vector<8x16xf32> -> vector<8x16xf32>
    %49 = arith.mulf %46, %33 : vector<8x112xf32>
    %c0_34 = arith.constant 0 : index
    %c0_35 = arith.constant 0 : index
    %50 = vector.load %arg6[%c0_34, %c0_35] : memref<112x16xbf16, #tpu.memory_space<vmem>>, vector<112x16xbf16>
    %51 = arith.extf %50 : vector<112x16xbf16> to vector<112x16xf32>
    %cst_36 = arith.constant dense<0.000000e+00> : vector<8x16xf32>
    %52 = tpu.matmul %49, %51, %cst_36 {dimension_numbers = #tpu.dot_dimension_numbers<[1], [0], [0], [1], [0, 0, 1, 1], [], []>} : vector<8x112xf32>, vector<112x16xf32>, vector<8x16xf32> -> vector<8x16xf32>
    %53 = arith.addf %48, %52 : vector<8x16xf32>
    %c0_37 = arith.constant 0 : index
    %c0_38 = arith.constant 0 : index
    %54 = vector.load %arg7[%c0_37, %c0_38] : memref<8x16xf32, #tpu.memory_space<vmem>>, vector<8x16xf32>
    tpu.vector_store %arg7[%c0_37, %c0_38], %53 {strides = array<i32>} : memref<8x16xf32, #tpu.memory_space<vmem>>, vector<8x16xf32>,
    return
  }
}

</mosaic_0001>

<bundles_post_ra>
// kernel: temporal_pattern_attention.1
= control target key start
LH: loop header
LB: loop body
LE: loop exit
PB: predicated region body
PF: predicated region fallthrough
CT: control target
= control target key end

     0   :  { %vm113_vm0 = vcmask 1043456   ;;  %vm114_vm1 = vcmask 1044480   ;;  %v1169_v0 = vmov 0.0   ;;  %v1170_v2 = vmov 65535   ;;  %s1173_s22 = smov 8   ;;  %s1175_s23 = smov 24   ;;  %s1398_s2 = inlined_call_operand.vmem [shape: bf16[25,8], index: 2, kind: input, shape index: {}]   ;;  %s1399_s0 = inlined_call_operand.vmem [shape: bf16[112,25], index: 0, kind: input, shape index: {}]   ;;  %s1400_s3 = inlined_call_operand.vmem [shape: bf16[17,112], index: 3, kind: input, shape index: {}]   ;;  %s1401_s5 = inlined_call_operand.vmem [shape: bf16[17,16], index: 5, kind: input, shape index: {}]   ;;  %s1402_s1 = inlined_call_operand.vmem [shape: bf16[8,17], index: 1, kind: input, shape index: {}]   ;;  %s1403_s4 = inlined_call_operand.vmem [shape: bf16[112,14], index: 4, kind: input, shape index: {}]   ;;  %s1404_s6 = inlined_call_operand.vmem [shape: bf16[112,16], index: 6, kind: input, shape index: {}]   ;;  %s1405_s7 = inlined_call_operand.vmem [shape: f32[8,16], index: 7, kind: output, shape index: {}]  }
   0x1   :  { %923 = vmatprep.subr.bf16.mxu0 %v1169_v0  ;;  %v1152_v1 = vld [vmem:[%s1398_s2] sm:$0xff]   ;;  %v115_v3 = vsel %vm113_vm0, 4294967295, %v1170_v2  ;;  %955 = vmatprep.subr.bf16.mxu1 %v1169_v0  ;;  %v1153_v4 = vld [vmem:[%s1398_s2 + $0x8] sm:$0x1f]   ;;  %vm1171_vm2 = vmmov 0   ;;  %vm91_vm3 = vcmask 203776  }
   0x2   :  { %924 = vmatpush3.bf16.msra.mxu0 %v1152_v1  ;;  %v116_v5 = vsel %vm114_vm1, %v115_v3, 0  ;;  %927 = vmatprep.mubr.msk.bf16.mxu0 %vm1171_vm2, %v1169_v0  ;;  %v1154_v7 = vld [vmem:[%s1399_s0] sm:$0xff]   ;;  %vm321_vm4 = vcmask 1040384   ;;  %v1172_v8 = vmov 0   ;;  %v1155_v13 = vld [vmem:[%s1399_s0 + $0x8] sm:$0xff]   ;;  %vm317_vm5 = vcmask 138240  }
   0x3   :  { %925 = vmatprep.subr.bf16.mxu0 %v1169_v0  ;;  %v118_v6 = vand.u32 %v1153_v4, %v116_v5  ;;  %959 = vmatprep.mubr.msk.bf16.mxu1 %vm1171_vm2, %v1169_v0  ;;  %v1244_v9 = vsel %vm321_vm4, 65535, %v1172_v8  ;;  %v1161_v10 = vld [vmem:[%s1400_s3] sm:$0xff]   ;;  %v1162_v11 = vld [vmem:[%s1400_s3 + $0x8] ss:$0 sps:$4 sm:$0x11]   ;;  %v1156_v15 = vld [vmem:[%s1399_s0 + $0x10] sm:$0xff]  }
   0x4   :  { %956 = vmatpush3.bf16.msra.mxu1 %v1161_v10  ;;  %v325_v12 = vand.u32 %v1162_v11, %v1244_v9  ;;  %v1262_v14 = vld [vmem:[%s1402_s1] sm:$0xf]  ;;  %v1157_v16 = vld [vmem:[%s1399_s0 + $0x18] sm:$0xff]   ;;  %v1159_v18 = vld [vmem:[%s1399_s0 + $0x28] sm:$0xff]   ;;  %vm223_vm6 = vcmask 64512   ;;  %s1176_s24 = smov 32  }
   0x5   :  { %957 = vmatprep.subr.bf16.mxu1 %v1169_v0  ;;  %v1158_v17 = vld [vmem:[%s1399_s0 + $0x20] sm:$0xff]   ;;  %v1160_v19 = vld [vmem:[%s1399_s0 + $0x30] sm:$0xff]   ;;  %s1174_s0 = smov 16   ;;  %s1177_s25 = smov 40   ;;  %v1178_v38 = vmov 0.0|0.0   ;;  %v1313_v41 = vld [vmem:[%s1403_s4 + $0x8] sm:$0xff]  }
   0x6   :  { %926 = vmatpush3.bf16.msra.mxu0 %v118_v6  ;;  %v1305_v39 = vld [vmem:[%s1403_s4] sm:$0xff]   ;;  %s1179_s2 = smov 48   ;;  %s1180_s30 = smov 56   ;;  %v852_v47 = vld [vmem:[%s1403_s4 + $0x10] sm:$0xff]   ;;  %v853_v49 = vld [vmem:[%s1403_s4 + $0x18] sm:$0xff]   ;;  %vm476_vm7 = vcmask 113664  }
   0x7   :  { %1085 = vmatprep.subr.bf16.mxu0 %v1178_v38  ;;  %s1181_s12 = smov 64   ;;  %s1182_s13 = smov 72   ;;  %v854_v55 = vld [vmem:[%s1403_s4 + $0x20] sm:$0xff]   ;;  %v855_v57 = vld [vmem:[%s1403_s4 + $0x28] sm:$0xff]   ;;  %v856_v3 = vld [vmem:[%s1403_s4 + $0x30] sm:$0xff]   ;;  %vm229_vm9 = vcmask 130112  }
   0x8   :  { %958 = vmatpush3.bf16.msra.mxu1 %v325_v12  ;;  %s1183_s16 = smov 80   ;;  %s1184_s17 = smov 88   ;;  %vm1087_vm8 = vmpackc.low %vm476_vm7, %vm476_vm7  ;;  %vm235_vm10 = vcmask 195712   ;;  %vm241_vm11 = vcmask 261312   ;;  %vm247_vm12 = vcmask 326912   ;;  %vm253_vm13 = vcmask 392512  }
   0x9   :  { %928 = vmatmul.mubr.msk.bf16.vlgmr.msra.gmra.mrb[0].mxu0 %vm91_vm3, %v1154_v7  ;;  %1064 = vmatprep.subr.bf16.mxu1 %v1178_v38  ;;  %s1185_s20 = smov 96   ;;  %s1186_s21 = smov 104   ;;  %vm259_vm14 = vcmask 458112   ;;  %vm265_vm15 = vcmask 523712   ;;  %vm271_vm0 = vcmask 589312   ;;  %vm277_vm1 = vcmask 654912  }
   0xa   :  { %931 = vmatprep.mubr.msk.bf16.mxu0 %vm1171_vm2, %v1169_v0  ;;  %vm289_vm4 = vcmask 786112  }
   0xb   :  { %960 = vmatmul.mubr.msk.bf16.vlgmr.msra.gmra.mrb[0].mxu1 %vm317_vm5, %v1262_v14 }
   0xc   :  { %991 = vmatprep.mubr.msk.f32.mxu1 %vm1171_vm2, %v1169_v0  ;;  %1066 = vmatpush3.bf16.msra.mxu1 %v1305_v39 }
   0xd   :  { %1067 = vmatprep.subr.bf16.mxu1 %v1178_v38 }
   0xf   :  { %1088 = vmatpush3.bf16.xpose.msk.msra.mxu0 %vm1087_vm8, %v1305_v39 }
  0x10   :  { %1069 = vmatpush3.bf16.msra.mxu1 %v1313_v41  ;;  %1089 = vmatprep.subr.bf16.mxu0 %v1178_v38 }
  0x11   :  { %932 = vmatmul.mubr.msk.bf16.gmra.mrb[4].mxu0 %vm91_vm3, %v1155_v13  ;;  %1070 = vmatprep.subr.bf16.mxu1 %v1178_v38 }
  0x12   :  { %935 = vmatprep.mubr.msk.bf16.mxu0 %vm1171_vm2, %v1169_v0 }
  0x14   :  { %1072 = vmatpush3.bf16.msra.mxu1 %v852_v47 }
  0x15   :  { %1073 = vmatprep.subr.bf16.mxu1 %v1178_v38 }
  0x17   :  { %1092 = vmatpush3.bf16.xpose.msk.msra.mxu0 %vm1087_vm8, %v1313_v41  ;;  %v1164_v41 = vld [vmem:[%s1401_s5] sm:$0xff]  }
  0x18   :  { %1075 = vmatpush3.bf16.msra.mxu1 %v853_v49  ;;  %1093 = vmatprep.subr.bf16.mxu0 %v1178_v38 }
  0x19   :  { %936 = vmatmul.mubr.msk.bf16.gmra.mrb[8].mxu0 %vm91_vm3, %v1156_v15  ;;  %1076 = vmatprep.subr.bf16.mxu1 %v1178_v38 }
  0x1a   :  { %939 = vmatprep.mubr.msk.bf16.mxu0 %vm1171_vm2, %v1169_v0 }
  0x1c   :  { %1078 = vmatpush3.bf16.msra.mxu1 %v854_v55 }
  0x1d   :  { %1079 = vmatprep.subr.bf16.mxu1 %v1178_v38 }
  0x1f   :  { %1096 = vmatpush3.bf16.xpose.msk.msra.mxu0 %vm1087_vm8, %v852_v47 }
  0x20   :  { %1081 = vmatpush3.bf16.msra.mxu1 %v855_v57  ;;  %1097 = vmatprep.subr.bf16.mxu0 %v1178_v38 }
  0x21   :  { %940 = vmatmul.mubr.msk.bf16.gmra.mrb[12].mxu0 %vm91_vm3, %v1157_v16  ;;  %1082 = vmatprep.subr.bf16.mxu1 %v1178_v38 }
  0x22   :  { %943 = vmatprep.mubr.msk.bf16.mxu0 %vm1171_vm2, %v1169_v0 }
  0x24   :  { %1084 = vmatpush3.bf16.msra.mxu1 %v856_v3 }
  0x25   :  { %1113 = vmatprep.subr.bf16.mxu1 %v1178_v38 }
  0x27   :  { %1100 = vmatpush3.bf16.xpose.msk.msra.mxu0 %vm1087_vm8, %v853_v49 }
  0x28   :  { %1101 = vmatprep.subr.bf16.mxu0 %v1178_v38 }
  0x29   :  { %944 = vmatmul.mubr.msk.bf16.gmra.mrb[16].mxu0 %vm91_vm3, %v1158_v17 }
  0x2a   :  { %947 = vmatprep.mubr.msk.bf16.mxu0 %vm1171_vm2, %v1169_v0 }
  0x2f   :  { %1104 = vmatpush3.bf16.xpose.msk.msra.mxu0 %vm1087_vm8, %v854_v55 }
  0x30   :  { %1105 = vmatprep.subr.bf16.mxu0 %v1178_v38 }
  0x31   :  { %948 = vmatmul.mubr.msk.bf16.gmra.mrb[20].mxu0 %vm91_vm3, %v1159_v18 }
  0x32   :  { %951 = vmatprep.mubr.msk.bf16.mxu0 %vm1171_vm2, %v1169_v0 }
  0x37   :  { %1108 = vmatpush3.bf16.xpose.msk.msra.mxu0 %vm1087_vm8, %v855_v57 }
  0x38   :  { %1109 = vmatprep.subr.bf16.mxu0 %v1178_v38 }
  0x39   :  { %952 = vmatmul.mubr.msk.bf16.gmra.mrb[24].mxu0 %vm91_vm3, %v1160_v19  ;;  %vm283_vm3 = vcmask 720512  }
  0x3a   :  { %1022 = vmatprep.mubr.msk.f32.mxu0 %vm1171_vm2, %v1169_v0 }
  0x3f   :  { %1112 = vmatpush3.bf16.xpose.msk.msra.mxu0 %vm1087_vm8, %v856_v3  ;;  %vm301_vm8 = vcmask 917312  }
  0x40   :  { %1056 = vmatprep.subr.bf16.mxu0 %v1169_v0 }
  0xdc   :  { %v154_v20 = vpop.f32.mrb[0].mxu0 }
  0xdd   :  { %v209_v21 = vmax.f32 %v154_v20, 0.0  ;;  %v929_v22 = vpop.f32.mrb[1].mxu0 }
  0xde   :  { %v157_v23 = vpop.f32.mrb[2].mxu0  ;;  %v1332_v63 = vpop.f32.mrb[0].mxu1 }
  0xdf   :  { %224 = vst.msk [vmem:[#allocation2] sm:$0xff] %vm223_vm6, %v209_v21  ;;  %v210_v24 = vmax.f32 %v157_v23, 0.0  ;;  %v930_v25 = vpop.f32.mrb[3].mxu0  ;;  %v961_v1 = vpop.f32.mrb[1].mxu1  ;;  %vm295_vm6 = vcmask 851712  }
  0xe0   :  { %v364_v2 = vpop.f32.mrb[2].mxu1 }
  0xe1   :  { %226 = vrot.lane.b32.xlu0 %v210_v24, %s1173_s22  ;;  %v962_v4 = vpop.f32.mrb[3].mxu1 }
  0xe4   :  { %v162_v26 = vpop.f32.mrb[4].mxu0 }
  0xe5   :  { %v211_v27 = vmax.f32 %v162_v26, 0.0  ;;  %v933_v28 = vpop.f32.mrb[5].mxu0 }
  0xe6   :  { %v165_v29 = vpop.f32.mrb[6].mxu0  ;;  %v824_v28 = vld [vmem:[%s1404_s6] sm:$0xff]  }
  0xe7   :  { %v212_v30 = vmax.f32 %v165_v29, 0.0  ;;  %232 = vrot.lane.b32.xlu0 %v211_v27, %s1174_s0  ;;  %v934_v31 = vpop.f32.mrb[7].mxu0  ;;  %v857_v29 = vld [vmem:[%s1404_s6 + $0x8] sm:$0xff]  }
  0xe8   :  { %v859_v31 = vld [vmem:[%s1404_s6 + $0x18] sm:$0xff]  }
  0xe9   :  { %238 = vrot.lane.b32.xlu1 %v212_v30, %s1175_s23  ;;  %v858_v30 = vld [vmem:[%s1404_s6 + $0x10] sm:$0xff]  }
  0xec   :  { %v170_v32 = vpop.f32.mrb[8].mxu0 }
  0xed   :  { %v213_v33 = vmax.f32 %v170_v32, 0.0  ;;  %v937_v34 = vpop.f32.mrb[9].mxu0  ;;  %v860_v32 = vld [vmem:[%s1404_s6 + $0x20] sm:$0xff]  }
  0xee   :  { %v173_v35 = vpop.f32.mrb[10].mxu0 }
  0xef   :  { %v214_v36 = vmax.f32 %v173_v35, 0.0  ;;  %244 = vrot.lane.b32.xlu1 %v213_v33, %s1176_s24  ;;  %v938_v37 = vpop.f32.mrb[11].mxu0  ;;  %v861_v33 = vld [vmem:[%s1404_s6 + $0x28] sm:$0xff]  }
  0xf1   :  { %250 = vrot.lane.b32.xlu0 %v214_v36, %s1177_s25 }
  0xf4   :  { %v178_v40 = vpop.f32.mrb[12].mxu0 }
  0xf5   :  { %v215_v42 = vmax.f32 %v178_v40, 0.0  ;;  %v941_v43 = vpop.f32.mrb[13].mxu0  ;;  %v1163_v40 = vld [vmem:[%s1401_s5 + $0x8] ss:$0 sps:$4 sm:$0x11]  }
  0xf6   :  { %v181_v44 = vpop.f32.mrb[14].mxu0  ;;  %v862_v43 = vld [vmem:[%s1404_s6 + $0x30] sm:$0xff]  }
  0xf7   :  { %v216_v45 = vmax.f32 %v181_v44, 0.0  ;;  %256 = vrot.lane.b32.xlu1 %v215_v42, %s1179_s2  ;;  %v942_v46 = vpop.f32.mrb[15].mxu0 }
  0xf9   :  { %262 = vrot.lane.b32.xlu0 %v216_v45, %s1180_s30 }
  0xfc   :  { %v186_v48 = vpop.f32.mrb[16].mxu0 }
  0xfd   :  { %v217_v50 = vmax.f32 %v186_v48, 0.0  ;;  %v945_v51 = vpop.f32.mrb[17].mxu0 }
  0xfe   :  { %v189_v52 = vpop.f32.mrb[18].mxu0 }
  0xff   :  { %v218_v53 = vmax.f32 %v189_v52, 0.0  ;;  %268 = vrot.lane.b32.xlu1 %v217_v50, %s1181_s12  ;;  %v946_v54 = vpop.f32.mrb[19].mxu0 }
 0x101   :  { %274 = vrot.lane.b32.xlu0 %v218_v53, %s1182_s13 }
 0x104   :  { %v194_v56 = vpop.f32.mrb[20].mxu0 }
 0x105   :  { %v219_v58 = vmax.f32 %v194_v56, 0.0  ;;  %v949_v59 = vpop.f32.mrb[21].mxu0 }
 0x106   :  { %v197_v60 = vpop.f32.mrb[22].mxu0 }
 0x107   :  { %v220_v61 = vmax.f32 %v197_v60, 0.0  ;;  %280 = vrot.lane.b32.xlu1 %v219_v58, %s1183_s16  ;;  %v950_v62 = vpop.f32.mrb[23].mxu0 }
 0x109   :  { %286 = vrot.lane.b32.xlu0 %v220_v61, %s1184_s17 }
 0x10c   :  { %v202_v5 = vpop.f32.mrb[24].mxu0 }
 0x10d   :  { %v221_v6 = vmax.f32 %v202_v5, 0.0  ;;  %v953_v7 = vpop.f32.mrb[25].mxu0 }
 0x10e   :  { %v205_v8 = vpop.f32.mrb[26].mxu0 }
 0x10f   :  { %v222_v10 = vmax.f32 %v205_v8, 0.0  ;;  %292 = vrot.lane.b32.xlu1 %v221_v6, %s1185_s20  ;;  %v954_v11 = vpop.f32.mrb[27].mxu0 }
 0x111   :  { %298 = vrot.lane.b32.xlu0 %v222_v10, %s1186_s21 }
 0x153   :  { %v227_v12 = vpop.permute.xlu0 %226 }
 0x154   :  { %230 = vst.msk [vmem:[#allocation2] sm:$0xff] %vm229_vm9, %v227_v12  ;;  %vm396_vm9 = vcmask 916480  }
 0x159   :  { %v233_v13 = vpop.permute.xlu0 %232 }
 0x15a   :  { %236 = vst.msk [vmem:[#allocation2] sm:$0xff] %vm235_vm10, %v233_v13 }
 0x15b   :  { %v239_v15 = vpop.permute.xlu1 %238 }
 0x15c   :  { %242 = vst.msk [vmem:[#allocation2] sm:$0xff] %vm241_vm11, %v239_v15 }
 0x161   :  { %v245_v16 = vpop.permute.xlu1 %244 }
 0x162   :  { %248 = vst.msk [vmem:[#allocation2] sm:$0xff] %vm247_vm12, %v245_v16 }
 0x163   :  { %v251_v17 = vpop.permute.xlu0 %250 }
 0x164   :  { %254 = vst.msk [vmem:[#allocation2] sm:$0xff] %vm253_vm13, %v251_v17 }
 0x169   :  { %v257_v18 = vpop.permute.xlu1 %256 }
 0x16a   :  { %260 = vst.msk [vmem:[#allocation2] sm:$0xff] %vm259_vm14, %v257_v18 }
 0x16b   :  { %v263_v19 = vpop.permute.xlu0 %262 }
 0x16c   :  { %266 = vst.msk [vmem:[#allocation2] sm:$0xff] %vm265_vm15, %v263_v19 }
 0x171   :  { %v269_v20 = vpop.permute.xlu1 %268 }
 0x172   :  { %272 = vst.msk [vmem:[#allocation2] sm:$0xff] %vm271_vm0, %v269_v20 }
 0x173   :  { %v275_v21 = vpop.permute.xlu0 %274 }
 0x174   :  { %278 = vst.msk [vmem:[#allocation2] sm:$0xff] %vm277_vm1, %v275_v21 }
 0x179   :  { %v281_v22 = vpop.permute.xlu1 %280 }
 0x17a   :  { %284 = vst.msk [vmem:[#allocation2] sm:$0xff] %vm283_vm3, %v281_v22 }
 0x17b   :  { %v287_v23 = vpop.permute.xlu0 %286 }
 0x17c   :  { %290 = vst.msk [vmem:[#allocation2] sm:$0xff] %vm289_vm4, %v287_v23 }
 0x181   :  { %v293_v24 = vpop.permute.xlu1 %292 }
 0x182   :  { %296 = vst.msk [vmem:[#allocation2] sm:$0xff] %vm295_vm6, %v293_v24 }
 0x183   :  { %v299_v25 = vpop.permute.xlu0 %298 }
 0x184   :  { %302 = vst.msk [vmem:[#allocation2] sm:$0xff] %vm301_vm8, %v299_v25 }
 0x18b   :  { %v303_v26 = vld [vmem:[#allocation2] sm:$0xff] }
 0x18c   :  { %v395_v27 = vmul.f32 %v1332_v63, %v303_v26 }
 0x18e   :  { %992 = vmatmul.mubr.msk.f32.vlgmr.msra.gmra.mrb[4].mxu1 %vm396_vm9, %v395_v27 }
 0x18f   :  { %1053 = vmatprep.mubr.msk.f32.mxu1 %vm1171_vm2, %v1169_v0  ;;  %1115 = vmatpush3.bf16.msra.mxu1 %v824_v28 }
 0x190   :  { %1116 = vmatprep.subr.bf16.mxu1 %v1178_v38 }
 0x193   :  { %1118 = vmatpush3.bf16.msra.mxu1 %v857_v29 }
 0x194   :  { %1119 = vmatprep.subr.bf16.mxu1 %v1178_v38 }
 0x197   :  { %1121 = vmatpush3.bf16.msra.mxu1 %v858_v30 }
 0x198   :  { %1122 = vmatprep.subr.bf16.mxu1 %v1178_v38 }
 0x19b   :  { %1124 = vmatpush3.bf16.msra.mxu1 %v859_v31 }
 0x19c   :  { %1125 = vmatprep.subr.bf16.mxu1 %v1178_v38 }
 0x19f   :  { %1127 = vmatpush3.bf16.msra.mxu1 %v860_v32 }
 0x1a0   :  { %1128 = vmatprep.subr.bf16.mxu1 %v1178_v38 }
 0x1a3   :  { %1130 = vmatpush3.bf16.msra.mxu1 %v861_v33 }
 0x1a4   :  { %1131 = vmatprep.subr.bf16.mxu1 %v1178_v38  ;;  %v707_v38 = vand.u32 %v1163_v40, %v1244_v9 }
 0x1a7   :  { %1133 = vmatpush3.bf16.msra.mxu1 %v862_v43 }
 0x261   :  { %v466_v34 = vpop.f32.mrb[4].mxu1 }
 0x262   :  { %v775_v35 = vmul.f32 -1.442695, %v466_v34  ;;  %v993_v36 = vpop.f32.mrb[5].mxu1 }
 0x264   :  { %1165 = vpow2.f32 %v775_v35 }
 0x26e   :  { %v1166_v37 = vpop.eup %1165 }
 0x26f   :  { %v473_v39 = vadd.f32 1.0, %v1166_v37 }
 0x271   :  { %1167 = vrcp.f32 %v473_v39 }
 0x27b   :  { %v1168_v42 = vpop.eup %1167 }
 0x27c   :  { %1023 = vmatmul.mubr.msk.f32.vlgmr.msra.gmra.mrb[28].mxu0 %vm476_vm7, %v1168_v42 }
 0x27d   :  { %1057 = vmatpush3.bf16.msra.mxu0 %v1164_v41  ;;  %1060 = vmatprep.mubr.msk.bf16.mxu0 %vm1171_vm2, %v1169_v0  ;;  %vm749_vm2 = vcmask 130048  }
 0x27e   :  { %1058 = vmatprep.subr.bf16.mxu0 %v1169_v0 }
 0x281   :  { %1059 = vmatpush3.bf16.msra.mxu0 %v707_v38 }
 0x284   :  { %1061 = vmatmul.mubr.msk.bf16.vlgmr.msra.gmra.mrb[32].mxu0 %vm317_vm5, %v1262_v14 }
 0x34f   :  { %v588_v44 = vpop.f32.mrb[28].mxu0 }
 0x350   :  { %v595_v45 = vmul.f32 %v588_v44, %v303_v26  ;;  %v1024_v46 = vpop.f32.mrb[29].mxu0 }
 0x352   :  { %1054 = vmatmul.mubr.msk.f32.vlgmr.msra.gmra.mrb[6].mxu1 %vm396_vm9, %v595_v45 }
 0x357   :  { %v743_v9 = vpop.f32.mrb[32].mxu0 }
 0x358   :  { %v1062_v47 = vpop.f32.mrb[33].mxu0 }
 0x359   :  { %v746_v48 = vpop.f32.mrb[34].mxu0 }
 0x35a   :  { %v1063_v49 = vpop.f32.mrb[35].mxu0 }
 0x425   :  { %v693_v50 = vpop.f32.mrb[6].mxu1 }
 0x426   :  { %v744_v0 = vadd.f32 %v743_v9, %v693_v50  ;;  %v1055_v51 = vpop.f32.mrb[7].mxu1 }
 0x428   :  { %750 = vst.msk [vmem:[%s1405_s7] sm:$0xff] %vm749_vm2, %v744_v0 }

</bundles_post_ra>
